<compile_context>
chip_gen: v7x
topology: tpu7x:2x2x1
jax: 0.10.0
libtpu: 0.0.40
codegen_flags: <defaults>
</compile_context>

<pallas_src>
import functools

import jax
import jax.numpy as jnp
import numpy as np
from jax.experimental import pallas as pl
from jax.experimental.pallas import tpu as pltpu

EPS = 1e-5      # nn.LayerNorm default
LANE = 128      # TPU lane width


def _round_up(v, m):
    return ((v + m - 1) // m) * m


@functools.lru_cache(maxsize=None)
def _single_buffer_supported():
    """One-time capability check: can grid-invariant operands use pl.Buffered(1)?"""
    if not hasattr(pl, "Buffered"):
        return False
    try:
        def probe(c_ref, x_ref, o_ref):
            o_ref[...] = x_ref[...] + c_ref[...]

        call = pl.pallas_call(
            probe,
            out_shape=jax.ShapeDtypeStruct((16, LANE), jnp.float32),
            grid=(2,),
            in_specs=[
                pl.BlockSpec((8, LANE), lambda i: (0, 0),
                             pipeline_mode=pl.Buffered(1)),
                pl.BlockSpec((8, LANE), lambda i: (i, 0)),
            ],
            out_specs=pl.BlockSpec((8, LANE), lambda i: (i, 0)),
        )
        jax.jit(call).lower(jnp.zeros((8, LANE), jnp.float32),
                            jnp.zeros((16, LANE), jnp.float32)).compile()
        return True
    except Exception:
        return False


def _layernorm(z, gamma, beta, true_n, eps):
    """LayerNorm over the last dim of f32 `z`.  The last dim may be zero-padded from
    `true_n` lanes up to z.shape[-1]; padded lanes of z are exactly 0 (zero weight
    columns) and padded gamma/beta are 0, so no iota/select masking is needed: the mean
    is a plain sum and the variance gets an analytic pad correction."""
    n_pad = z.shape[-1]
    inv_n = 1.0 / true_n
    mu = jnp.sum(z, axis=-1, keepdims=True) * inv_n
    zc = z - mu
    ss = jnp.sum(zc * zc, axis=-1, keepdims=True)
    if n_pad != true_n:                       # remove the padded (0 - mu)^2 terms
        ss = ss - (n_pad - true_n) * (mu * mu)
    var = jnp.maximum(ss, 0.0) * inv_n
    return zc * jax.lax.rsqrt(var + eps) * gamma + beta


def _head_kernel(x_ref, w1_ref, aff1_ref, w2_ref, aff2_ref, o_ref, *, hid_true, eps):
    # Linear 1 (no bias): cast x in-kernel to the weight dtype (bf16 MXU fast path),
    # accumulate in f32 for the LayerNorm math.
    h = jnp.dot(x_ref[...].astype(w1_ref.dtype), w1_ref[...],
                preferred_element_type=jnp.float32)
    aff1 = aff1_ref[...]
    h = _layernorm(h, aff1[0:1, :], aff1[1:2, :], hid_true, eps)
    h = jnp.maximum(h, 0.0)
    # Linear 2 (no bias)
    y = jnp.dot(h.astype(w2_ref.dtype), w2_ref[...],
                preferred_element_type=jnp.float32)
    aff2 = aff2_ref[...]
    y = _layernorm(y, aff2[0:1, :], aff2[1:2, :], y.shape[-1], eps)
    o_ref[...] = y.astype(o_ref.dtype)


def _head_kernel_ktiled(x_ref, w1_ref, aff1_ref, w2_ref, aff2_ref, o_ref, acc_ref,
                        *, hid_true, eps):
    k = pl.program_id(1)

    @pl.when(k == 0)
    def _():
        acc_ref[...] = jnp.zeros_like(acc_ref)

    acc_ref[...] += jnp.dot(x_ref[...].astype(w1_ref.dtype), w1_ref[...],
                            preferred_element_type=jnp.float32)

    @pl.when(k == pl.num_programs(1) - 1)
    def _():
        aff1 = aff1_ref[...]
        h = _layernorm(acc_ref[...], aff1[0:1, :], aff1[1:2, :], hid_true, eps)
        h = jnp.maximum(h, 0.0)
        y = jnp.dot(h.astype(w2_ref.dtype), w2_ref[...],
                    preferred_element_type=jnp.float32)
        aff2 = aff2_ref[...]
        y = _layernorm(y, aff2[0:1, :], aff2[1:2, :], y.shape[-1], eps)
        o_ref[...] = y.astype(o_ref.dtype)


def prepare_projection_head_params(w1, g1, b1, w2, g2, b2, *, param_dtype=None,
                                   k_block=None, w1_resident_limit_bytes=28 << 20):
    """One-time parameter preparation (do NOT call per forward pass).

    w1: (in_f, hid)  -- PyTorch Linear weight (hid, in_f) pre-transposed.
    w2: (hid, out_f) -- PyTorch Linear weight (out_f, hid) pre-transposed.
    g1, b1: LayerNorm(hid) affine; g2, b2: LayerNorm(out_f) affine.
    param_dtype: optional weight dtype (e.g. jnp.bfloat16) for the fast MXU path.
    k_block: force K-tiling with this chunk of in_f; None = auto (only when the
             resident W1 would exceed w1_resident_limit_bytes, e.g. on v7x).
    """
    in_f, hid = w1.shape
    assert w2.shape[0] == hid
    out_f = w2.shape[1]
    wdtype = jnp.dtype(param_dtype) if param_dtype is not None else jnp.dtype(w1.dtype)

    hid_p = _round_up(hid, LANE)
    w1 = w1.astype(wdtype)
    w2 = w2.astype(wdtype)
    aff1 = jnp.concatenate([jnp.reshape(g1, (1, -1)), jnp.reshape(b1, (1, -1))],
                           axis=0).astype(jnp.float32)
    aff2 = jnp.concatenate([jnp.reshape(g2, (1, -1)), jnp.reshape(b2, (1, -1))],
                           axis=0).astype(jnp.float32)
    if hid_p != hid:   # zero-pad hidden: zero W1 cols / gamma1 / beta1 / W2 rows
        w1 = jnp.pad(w1, ((0, 0), (0, hid_p - hid)))
        aff1 = jnp.pad(aff1, ((0, 0), (0, hid_p - hid)))
        w2 = jnp.pad(w2, ((0, hid_p - hid), (0, 0)))

    if k_block is None and in_f * hid_p * wdtype.itemsize > w1_resident_limit_bytes:
        k_block = 512                       # stream W1 in (512, hid_p) chunks
    in_padded = in_f
    if k_block is not None:
        k_block = _round_up(min(k_block, in_f), LANE)
        in_padded = _round_up(in_f, k_block)
        if in_padded != in_f:
            w1 = jnp.pad(w1, ((0, in_padded - in_f), (0, 0)))

    return dict(w1=w1, aff1=aff1, w2=w2, aff2=aff2,
                in_features=in_f, hidden_features=hid, out_features=out_f,
                hid_padded=hid_p, in_padded=in_padded, k_block=k_block)


def _vmem_bytes(block_b, in_blk, hid_p, out_f, x_isz, w_isz, wbuf, k_tiled):
    est = 2 * block_b * in_blk * x_isz                 # x tiles (double-buffered)
    est += 2 * block_b * out_f * x_isz                 # out tiles (double-buffered)
    if k_tiled:
        est += 2 * in_blk * hid_p * w_isz              # streamed W1 K-chunks
        est += block_b * hid_p * 4                     # f32 accumulator scratch
    else:
        est += wbuf * in_blk * hid_p * w_isz           # resident W1
    est += wbuf * hid_p * out_f * w_isz                # resident W2
    est += wbuf * 8 * (hid_p + out_f)                  # packed f32 affines (2 rows)
    # f32 intermediates + in-kernel casts of x and h
    est += block_b * (hid_p * (4 + w_isz) + out_f * 4 + in_blk * w_isz)
    return est


def projection_head(x, params, *, block_b=None):
    """x: (B, in_features) in its native dtype (no wrapper-side pad/cast of x)."""
    B, in_f = x.shape
    assert in_f == params["in_features"]
    w1, aff1, w2, aff2 = params["w1"], params["aff1"], params["w2"], params["aff2"]
    hid = params["hidden_features"]
    hid_p = params["hid_padded"]
    out_f = params["out_features"]
    k_block = params["k_block"]
    k_tiled = k_block is not None
    in_blk = k_block if k_tiled else in_f
    out_dtype = x.dtype
    x_isz = x.dtype.itemsize
    w_isz = w1.dtype.itemsize

    single_buf = _single_buffer_supported()
    wbuf = 1 if single_buf else 2

    try:
        vmem_cap = int(pltpu.get_tpu_info().vmem_capacity_bytes)
    except Exception:
        vmem_cap = 64 << 20                 # conservative default (v7x per-TC VMEM)

    # --- batch tile: >=2 grid steps when possible (v7x 2-TC sharding + pipelining);
    #     bigger tiles on 128-MiB-VMEM parts (v5e/v6e) amortize per-step overhead.
    sub = 16 if x.dtype == jnp.bfloat16 else 8
    if block_b is None:
        cap = 256 if vmem_cap <= (64 << 20) else 512
        block_b = B if B <= sub else min(cap, _round_up(pl.cdiv(B, 2), sub))
    if block_b >= B:
        block_b = B                          # full-dim block is always layout-legal
    else:
        block_b = max(sub, (block_b // sub) * sub)
    while (block_b > sub and
           _vmem_bytes(block_b, in_blk, hid_p, out_f, x_isz, w_isz, wbuf, k_tiled)
           > int(0.75 * vmem_cap)):
        block_b = max(sub, ((block_b // 2) // sub) * sub)

    vmem_est = _vmem_bytes(block_b, in_blk, hid_p, out_f, x_isz, w_isz, wbuf, k_tiled)
    vmem_limit = int(min(max(2 * vmem_est, 32 << 20), int(0.9 * vmem_cap)))

    cost = pl.CostEstimate(
        flops=int(2 * B * in_f * hid_p + 2 * B * hid_p * out_f
                  + 10 * B * (hid_p + out_f)),
        transcendentals=int(2 * B),          # one rsqrt per row per LayerNorm
        bytes_accessed=int(B * in_f * x_isz + w1.size * w_isz + w2.size * w_isz
                           + 4 * (aff1.size + aff2.size) + B * out_f * x_isz),
    )

    if k_tiled:
        in_padded = params["in_padded"]
        if in_padded != in_f:
            # Only hit when in_features is not a multiple of k_block (rare for the
            # large-in_f shapes that trigger K-tiling); needed for correct DMA blocks.
            x = jnp.pad(x, ((0, 0), (0, in_padded - in_f)))

        inv_map = lambda i, k: (0, 0)

        def const_spec(shape):
            if single_buf:   # grid-invariant: skip the never-refilled 2nd buffer
                return pl.BlockSpec(shape, inv_map, pipeline_mode=pl.Buffered(1))
            return pl.BlockSpec(shape, inv_map)

        grid = (pl.cdiv(B, block_b), in_padded // k_block)
        kernel = functools.partial(_head_kernel_ktiled, hid_true=hid, eps=EPS)
        grid_spec = pltpu.PrefetchScalarGridSpec(
            num_scalar_prefetch=0,
            grid=grid,
            in_specs=[
                pl.BlockSpec((block_b, k_block), lambda i, k: (i, k)),  # x K-chunk
                pl.BlockSpec((k_block, hid_p), lambda i, k: (k, 0)),    # W1 K-chunk
                const_spec((2, hid_p)),                                 # gamma1/beta1
                const_spec((hid_p, out_f)),                             # W2 (resident)
                const_spec((2, out_f)),                                 # gamma2/beta2
            ],
            out_specs=pl.BlockSpec((block_b, out_f), lambda i, k: (i, 0)),
            scratch_shapes=[pltpu.VMEM((block_b, hid_p), jnp.float32)],
        )
        dims = ("parallel", "arbitrary")
    else:
        inv_map = lambda i: (0, 0)

        def const_spec(shape):
            if single_buf:
                return pl.BlockSpec(shape, inv_map, pipeline_mode=pl.Buffered(1))
            return pl.BlockSpec(shape, inv_map)

        grid = (pl.cdiv(B, block_b),)
        kernel = functools.partial(_head_kernel, hid_true=hid, eps=EPS)
        grid_spec = pltpu.PrefetchScalarGridSpec(
            num_scalar_prefetch=0,
            grid=grid,
            in_specs=[
                pl.BlockSpec((block_b, in_f), lambda i: (i, 0)),  # x (native width)
                const_spec((in_f, hid_p)),                        # W1 (resident)
                const_spec((2, hid_p)),                           # gamma1/beta1
                const_spec((hid_p, out_f)),                       # W2 (resident)
                const_spec((2, out_f)),                           # gamma2/beta2
            ],
            out_specs=pl.BlockSpec((block_b, out_f), lambda i: (i, 0)),
        )
        dims = ("parallel",)

    return pl.pallas_call(
        kernel,
        out_shape=jax.ShapeDtypeStruct((B, out_f), out_dtype),
        grid_spec=grid_spec,
        compiler_params=pltpu.CompilerParams(
            dimension_semantics=dims,
            vmem_limit_bytes=vmem_limit,
        ),
        cost_estimate=cost,
    )(x, w1, aff1, w2, aff2)


def reference(x, w1, g1, b1, w2, g2, b2):
    x = x.astype(jnp.float32)
    h = x @ w1.astype(jnp.float32)
    mu = jnp.mean(h, -1, keepdims=True)
    var = jnp.mean((h - mu) ** 2, -1, keepdims=True)
    h = (h - mu) / jnp.sqrt(var + EPS) * g1 + b1
    h = jnp.maximum(h, 0.0)
    y = h @ w2.astype(jnp.float32)
    mu2 = jnp.mean(y, -1, keepdims=True)
    var2 = jnp.mean((y - mu2) ** 2, -1, keepdims=True)
    return (y - mu2) / jnp.sqrt(var2 + EPS) * g2 + b2


if __name__ == "__main__":
    batch, in_features, hidden_features, out_features = 8, 32, 64, 16

    key = jax.random.PRNGKey(0)
    kx, kw1, kw2, kg1, kb1, kg2, kb2, kx2, kw1b = jax.random.split(key, 9)

    x = jax.random.normal(kx, (batch, in_features), dtype=jnp.float32)
    # PyTorch Linear stores W as (out, in); pre-transpose to (in, out) for x @ W.
    w1 = (jax.random.normal(kw1, (hidden_features, in_features), dtype=jnp.float32)
          * (1.0 / np.sqrt(in_features))).T
    w2 = (jax.random.normal(kw2, (out_features, hidden_features), dtype=jnp.float32)
          * (1.0 / np.sqrt(hidden_features))).T
    g1 = 1.0 + 0.1 * jax.random.normal(kg1, (1, hidden_features), dtype=jnp.float32)
    b1 = 0.1 * jax.random.normal(kb1, (1, hidden_features), dtype=jnp.float32)
    g2 = 1.0 + 0.1 * jax.random.normal(kg2, (1, out_features), dtype=jnp.float32)
    b2 = 0.1 * jax.random.normal(kb2, (1, out_features), dtype=jnp.float32)

    ref = reference(x, w1, g1, b1, w2, g2, b2)

    # 1) f32 path (weights resident, single batch-tiled grid axis).
    params = prepare_projection_head_params(w1, g1, b1, w2, g2, b2)
    out = jax.block_until_ready(projection_head(x, params))
    np.testing.assert_allclose(np.asarray(out), np.asarray(ref), rtol=1e-5, atol=2e-5)

    # 2) bf16 weight path (weights cast ONCE at prepare time; x stays f32 and is cast
    #    in-kernel right before the MXU).  Loose check vs the f32 reference.
    params_bf16 = prepare_projection_head_params(w1, g1, b1, w2, g2, b2,
                                                 param_dtype=jnp.bfloat16)
    out_bf16 = jax.block_until_ready(projection_head(x, params_bf16))
    np.testing.assert_allclose(np.asarray(out_bf16.astype(jnp.float32)),
                               np.asarray(ref), rtol=1e-1, atol=1e-1)

    # 3) K-tiled path (forced at small shapes to exercise the streaming-W1 kernel:
    #    2 batch blocks x 2 K blocks with an f32 VMEM accumulator).
    batch2, in2 = 16, 256
    x2 = jax.random.normal(kx2, (batch2, in2), dtype=jnp.float32)
    w1b = (jax.random.normal(kw1b, (hidden_features, in2), dtype=jnp.float32)
           * (1.0 / np.sqrt(in2))).T
    ref2 = reference(x2, w1b, g1, b1, w2, g2, b2)
    params_kt = prepare_projection_head_params(w1b, g1, b1, w2, g2, b2, k_block=128)
    out2 = jax.block_until_ready(projection_head(x2, params_kt))
    np.testing.assert_allclose(np.asarray(out2), np.asarray(ref2), rtol=1e-5, atol=2e-5)

    print("KERNEL_OK")
</pallas_src>

<mosaic_0001>
module attributes {stable_mosaic.version = 11 : i64} {
  func.func @_head_kernel(%arg0: i32, %arg1: memref<8x32xf32, #tpu.memory_space<vmem>>, %arg2: memref<32x128xf32, #tpu.memory_space<vmem>>, %arg3: memref<2x128xf32, #tpu.memory_space<vmem>>, %arg4: memref<128x16xf32, #tpu.memory_space<vmem>>, %arg5: memref<2x16xf32, #tpu.memory_space<vmem>>, %arg6: memref<8x16xf32, #tpu.memory_space<vmem>>) attributes {dimension_semantics = [#tpu.dimension_semantics<parallel>], iteration_bounds = array<i64: 1>, scalar_prefetch = 0 : i64, scratch_operands = 0 : i64, tpu.core_type = #tpu.core_type<tc>, window_params = [{transform_indices = @transform_0, window_bounds = array<i64: 8, 32>}, {pipeline_mode = #tpu.pipeline_mode<synchronous>, transform_indices = @transform_1, window_bounds = array<i64: 32, 128>}, {pipeline_mode = #tpu.pipeline_mode<synchronous>, transform_indices = @transform_2, window_bounds = array<i64: 2, 128>}, {pipeline_mode = #tpu.pipeline_mode<synchronous>, transform_indices = @transform_3, window_bounds = array<i64: 128, 16>}, {pipeline_mode = #tpu.pipeline_mode<synchronous>, transform_indices = @transform_4, window_bounds = array<i64: 2, 16>}, {transform_indices = @transform_5, window_bounds = array<i64: 8, 16>}]} {
    %c0 = arith.constant 0 : index
    %c0_0 = arith.constant 0 : index
    %0 = vector.load %arg1[%c0, %c0_0] : memref<8x32xf32, #tpu.memory_space<vmem>>, vector<8x32xf32>
    %c0_1 = arith.constant 0 : index
    %c0_2 = arith.constant 0 : index
    %1 = vector.load %arg2[%c0_1, %c0_2] : memref<32x128xf32, #tpu.memory_space<vmem>>, vector<32x128xf32>
    %cst = arith.constant dense<0.000000e+00> : vector<8x128xf32>
    %2 = tpu.matmul %0, %1, %cst {dimension_numbers = #tpu.dot_dimension_numbers<[1], [0], [0], [1], [0, 0, 1, 1], [], []>} : vector<8x32xf32>, vector<32x128xf32>, vector<8x128xf32> -> vector<8x128xf32>
    %c0_3 = arith.constant 0 : index
    %c0_4 = arith.constant 0 : index
    %3 = vector.load %arg3[%c0_3, %c0_4] : memref<2x128xf32, #tpu.memory_space<vmem>>, vector<2x128xf32>
    %4 = vector.extract_strided_slice %3 {offsets = [0, 0], sizes = [1, 128], strides = [1, 1]} : vector<2x128xf32> to vector<1x128xf32>
    %5 = vector.extract_strided_slice %3 {offsets = [1, 0], sizes = [1, 128], strides = [1, 1]} : vector<2x128xf32> to vector<1x128xf32>
    %cst_5 = arith.constant dense<0.000000e+00> : vector<8xf32>
    %6 = vector.multi_reduction <add>, %2, %cst_5 [1] : vector<8x128xf32> to vector<8xf32>
    %7 = vector.shape_cast %6 : vector<8xf32> to vector<8x1xf32>
    %cst_6 = arith.constant 1.562500e-02 : f32
    %8 = vector.broadcast %cst_6 : f32 to vector<8x1xf32>
    %9 = arith.mulf %7, %8 : vector<8x1xf32>
    %10 = vector.broadcast %9 : vector<8x1xf32> to vector<8x128xf32>
    %11 = arith.subf %2, %10 : vector<8x128xf32>
    %12 = arith.mulf %11, %11 : vector<8x128xf32>
    %cst_7 = arith.constant dense<0.000000e+00> : vector<8xf32>
    %13 = vector.multi_reduction <add>, %12, %cst_7 [1] : vector<8x128xf32> to vector<8xf32>
    %14 = vector.shape_cast %13 : vector<8xf32> to vector<8x1xf32>
    %15 = arith.mulf %9, %9 : vector<8x1xf32>
    %cst_8 = arith.constant 6.400000e+01 : f32
    %16 = vector.broadcast %cst_8 : f32 to vector<8x1xf32>
    %17 = arith.mulf %16, %15 : vector<8x1xf32>
    %18 = arith.subf %14, %17 : vector<8x1xf32>
    %cst_9 = arith.constant 0.000000e+00 : f32
    %19 = vector.broadcast %cst_9 : f32 to vector<8x1xf32>
    %20 = arith.maximumf %18, %19 : vector<8x1xf32>
    %cst_10 = arith.constant 1.562500e-02 : f32
    %21 = vector.broadcast %cst_10 : f32 to vector<8x1xf32>
    %22 = arith.mulf %20, %21 : vector<8x1xf32>
    %cst_11 = arith.constant 9.99999974E-6 : f32
    %23 = vector.broadcast %cst_11 : f32 to vector<8x1xf32>
    %24 = arith.addf %22, %23 : vector<8x1xf32>
    %25 = math.rsqrt %24 : vector<8x1xf32>
    %26 = vector.broadcast %25 : vector<8x1xf32> to vector<8x128xf32>
    %27 = arith.mulf %11, %26 : vector<8x128xf32>
    %28 = vector.broadcast %4 : vector<1x128xf32> to vector<8x128xf32>
    %29 = arith.mulf %27, %28 : vector<8x128xf32>
    %30 = vector.broadcast %5 : vector<1x128xf32> to vector<8x128xf32>
    %31 = arith.addf %29, %30 : vector<8x128xf32>
    %cst_12 = arith.constant 0.000000e+00 : f32
    %32 = vector.broadcast %cst_12 : f32 to vector<8x128xf32>
    %33 = arith.maximumf %31, %32 : vector<8x128xf32>
    %c0_13 = arith.constant 0 : index
    %c0_14 = arith.constant 0 : index
    %34 = vector.load %arg4[%c0_13, %c0_14] : memref<128x16xf32, #tpu.memory_space<vmem>>, vector<128x16xf32>
    %cst_15 = arith.constant dense<0.000000e+00> : vector<8x16xf32>
    %35 = tpu.matmul %33, %34, %cst_15 {dimension_numbers = #tpu.dot_dimension_numbers<[1], [0], [0], [1], [0, 0, 1, 1], [], []>} : vector<8x128xf32>, vector<128x16xf32>, vector<8x16xf32> -> vector<8x16xf32>
    %c0_16 = arith.constant 0 : index
    %c0_17 = arith.constant 0 : index
    %36 = vector.load %arg5[%c0_16, %c0_17] : memref<2x16xf32, #tpu.memory_space<vmem>>, vector<2x16xf32>
    %37 = vector.extract_strided_slice %36 {offsets = [0, 0], sizes = [1, 16], strides = [1, 1]} : vector<2x16xf32> to vector<1x16xf32>
    %38 = vector.extract_strided_slice %36 {offsets = [1, 0], sizes = [1, 16], strides = [1, 1]} : vector<2x16xf32> to vector<1x16xf32>
    %cst_18 = arith.constant dense<0.000000e+00> : vector<8xf32>
    %39 = vector.multi_reduction <add>, %35, %cst_18 [1] : vector<8x16xf32> to vector<8xf32>
    %40 = vector.shape_cast %39 : vector<8xf32> to vector<8x1xf32>
    %cst_19 = arith.constant 6.250000e-02 : f32
    %41 = vector.broadcast %cst_19 : f32 to vector<8x1xf32>
    %42 = arith.mulf %40, %41 : vector<8x1xf32>
    %43 = vector.broadcast %42 : vector<8x1xf32> to vector<8x16xf32>
    %44 = arith.subf %35, %43 : vector<8x16xf32>
    %45 = arith.mulf %44, %44 : vector<8x16xf32>
    %cst_20 = arith.constant dense<0.000000e+00> : vector<8xf32>
    %46 = vector.multi_reduction <add>, %45, %cst_20 [1] : vector<8x16xf32> to vector<8xf32>
    %47 = vector.shape_cast %46 : vector<8xf32> to vector<8x1xf32>
    %cst_21 = arith.constant 0.000000e+00 : f32
    %48 = vector.broadcast %cst_21 : f32 to vector<8x1xf32>
    %49 = arith.maximumf %47, %48 : vector<8x1xf32>
    %cst_22 = arith.constant 6.250000e-02 : f32
    %50 = vector.broadcast %cst_22 : f32 to vector<8x1xf32>
    %51 = arith.mulf %49, %50 : vector<8x1xf32>
    %cst_23 = arith.constant 9.99999974E-6 : f32
    %52 = vector.broadcast %cst_23 : f32 to vector<8x1xf32>
    %53 = arith.addf %51, %52 : vector<8x1xf32>
    %54 = math.rsqrt %53 : vector<8x1xf32>
    %55 = vector.broadcast %54 : vector<8x1xf32> to vector<8x16xf32>
    %56 = arith.mulf %44, %55 : vector<8x16xf32>
    %57 = vector.broadcast %37 : vector<1x16xf32> to vector<8x16xf32>
    %58 = arith.mulf %56, %57 : vector<8x16xf32>
    %59 = vector.broadcast %38 : vector<1x16xf32> to vector<8x16xf32>
    %60 = arith.addf %58, %59 : vector<8x16xf32>
    %c0_24 = arith.constant 0 : index
    %c0_25 = arith.constant 0 : index
    %61 = vector.load %arg6[%c0_24, %c0_25] : memref<8x16xf32, #tpu.memory_space<vmem>>, vector<8x16xf32>
    tpu.vector_store %arg6[%c0_24, %c0_25], %60 {strides = array<i32>} : memref<8x16xf32, #tpu.memory_space<vmem>>, vector<8x16xf32>,
    return
  }
  func.func @transform_0(%arg0: i32) -> (i32, i32) {
    %c0_i32 = arith.constant 0 : i32
    %c0_i32_0 = arith.constant 0 : i32
    return %arg0, %c0_i32 : i32, i32
  }
  func.func @transform_1(%arg0: i32) -> (i32, i32) {
    %c0_i32 = arith.constant 0 : i32
    %c0_i32_0 = arith.constant 0 : i32
    %c0_i32_1 = arith.constant 0 : i32
    return %c0_i32, %c0_i32_0 : i32, i32
  }
  func.func @transform_2(%arg0: i32) -> (i32, i32) {
    %c0_i32 = arith.constant 0 : i32
    %c0_i32_0 = arith.constant 0 : i32
    %c0_i32_1 = arith.constant 0 : i32
    return %c0_i32, %c0_i32_0 : i32, i32
  }
  func.func @transform_3(%arg0: i32) -> (i32, i32) {
    %c0_i32 = arith.constant 0 : i32
    %c0_i32_0 = arith.constant 0 : i32
    %c0_i32_1 = arith.constant 0 : i32
    return %c0_i32, %c0_i32_0 : i32, i32
  }
  func.func @transform_4(%arg0: i32) -> (i32, i32) {
    %c0_i32 = arith.constant 0 : i32
    %c0_i32_0 = arith.constant 0 : i32
    %c0_i32_1 = arith.constant 0 : i32
    return %c0_i32, %c0_i32_0 : i32, i32
  }
  func.func @transform_5(%arg0: i32) -> (i32, i32) {
    %c0_i32 = arith.constant 0 : i32
    %c0_i32_0 = arith.constant 0 : i32
    return %arg0, %c0_i32 : i32, i32
  }
}

</mosaic_0001>

<bundles_post_ra>
// kernel: tpu_custom_call.1
= control target key start
LH: loop header
LB: loop body
LE: loop exit
PB: predicated region body
PF: predicated region fallthrough
CT: control target
= control target key end

     0   :  { %v385_v3 = vmov 0.0|0.0   ;;  %vm386_vm0 = vmmov 0   ;;  %v387_v6 = vmov 0.0   ;;  %s503_s0 = inlined_call_operand.vmem [shape: f32[8,32], index: 0, kind: input, shape index: {}]   ;;  %s504_s1 = inlined_call_operand.vmem [shape: f32[32,128], index: 1, kind: input, shape index: {}]   ;;  %s505_s2 = inlined_call_operand.vmem [shape: f32[2,128], index: 2, kind: input, shape index: {}]   ;;  %s506_s3 = inlined_call_operand.vmem [shape: f32[128,16], index: 3, kind: input, shape index: {}]   ;;  %s507_s4 = inlined_call_operand.vmem [shape: f32[2,16], index: 4, kind: input, shape index: {}]   ;;  %s508_s5 = inlined_call_operand.hbm [shape: f32[8,16], index: 5, kind: output, shape index: {}]  }
   0x1   :  { %v22_v0 = vld [vmem:[%s504_s1] sm:$0xff]  ;;  %v23_v1 = vld [vmem:[%s504_s1 + $0x8] sm:$0xff]  ;;  %v24_v2 = vld [vmem:[%s504_s1 + $0x10] sm:$0xff]  ;;  %323 = vmatprep.subr.bf16.mxu0 %v385_v3  ;;  %285 = vmatprep.mubr.msk.f32.mxu0 %vm386_vm0, %v387_v6 }
   0x2   :  { %v324_v4 = vpack.c.bf16 %v23_v1, %v22_v0  ;;  %v25_v5 = vld [vmem:[%s504_s1 + $0x18] sm:$0xff] }
   0x3   :  { %10 = vsyncpa [#allocation3], 0  ;;  %329 = vmatprep.subr.bf16.mxu1 %v385_v3  ;;  %320 = vmatprep.mubr.msk.f32.mxu1 %vm386_vm0, %v387_v6  ;;  %v327_v7 = vpack.c.bf16 %v25_v5, %v24_v2  ;;  %v21_v8 = vld [vmem:[%s503_s0] sm:$0xff]  ;;  %vm26_vm1 = vcmask 261120   ;;  %v128_v12 = vld [vmem:[%s506_s3 + $0x8] sm:$0xff]  ;;  %v116_v45 = vlaneseq  ;;  %vm214_vm2 = vcmask 130048  }
   0x4   :  { %325 = vmatpush3.bf16.msra.mxu0 %v324_v4  ;;  %v127_v11 = vld [vmem:[%s506_s3] sm:$0xff]  ;;  %v129_v18 = vld [vmem:[%s506_s3 + $0x10] sm:$0xff]  ;;  %v130_v19 = vld [vmem:[%s506_s3 + $0x18] sm:$0xff]  ;;  %s388_s8 = smov [#allocation2]  }
   0x5   :  { %326 = vmatprep.subr.bf16.mxu0 %v385_v3  ;;  %v330_v13 = vpack.c.bf16 %v128_v12, %v127_v11  ;;  %v333_v20 = vpack.c.bf16 %v130_v19, %v129_v18  ;;  %v131_v21 = vld [vmem:[%s506_s3 + $0x20] sm:$0xff]  ;;  %v132_v22 = vld [vmem:[%s506_s3 + $0x28] sm:$0xff]  ;;  %v133_v24 = vld [vmem:[%s506_s3 + $0x30] sm:$0xff]  ;;  %v117_v47 = vshrl.u32 %v116_v45, 7  ;;  %s246_s9 = sshll.u32 %s388_s8, 4  ;;  %s247_s9 = int_to_ptr.vmem [resolvable:$true] %s246_s9 }
   0x6   :  { %v336_v23 = vpack.c.bf16 %v132_v22, %v131_v21  ;;  %v134_v25 = vld [vmem:[%s506_s3 + $0x38] sm:$0xff]  ;;  %v135_v27 = vld [vmem:[%s506_s3 + $0x40] sm:$0xff]  ;;  %v136_v28 = vld [vmem:[%s506_s3 + $0x48] sm:$0xff]  ;;  %s361_s10 = scalar_lea.vmem %s247_s9, 128  ;;  %p366_p1 = scmp.lt.s32.totalorder %s247_s9, %s247_s9 }
   0x7   :  { %331 = vmatpush3.bf16.msra.mxu1 %v330_v13  ;;  %v339_v26 = vpack.c.bf16 %v134_v25, %v133_v24  ;;  %v342_v29 = vpack.c.bf16 %v136_v28, %v135_v27  ;;  %v137_v30 = vld [vmem:[%s506_s3 + $0x50] sm:$0xff]  ;;  %v138_v31 = vld [vmem:[%s506_s3 + $0x58] sm:$0xff]  ;;  %v139_v33 = vld [vmem:[%s506_s3 + $0x60] sm:$0xff]  ;;  %v118_v48 = vsub.s32 0, %v117_v47  ;;  %v123_v50 = vsub.s32 1, %v117_v47  ;;  %p362_p0 = scmp.ne.s32.totalorder %s247_s9, %s361_s10  ;;  %p367_p2 = scmp.lt.s32.totalorder %s361_s10, %s361_s10 }
   0x8   :  { %328 = vmatpush3.bf16.msra.mxu0 %v327_v7  ;;  %332 = vmatprep.subr.bf16.mxu1 %v385_v3  ;;  %v345_v32 = vpack.c.bf16 %v138_v31, %v137_v30  ;;  %v140_v34 = vld [vmem:[%s506_s3 + $0x68] sm:$0xff]  ;;  %v141_v36 = vld [vmem:[%s506_s3 + $0x70] sm:$0xff]  ;;  %v142_v37 = vld [vmem:[%s506_s3 + $0x78] sm:$0xff] }
   0x9   :  { %v348_v35 = vpack.c.bf16 %v140_v34, %v139_v33  ;;  %v351_v38 = vpack.c.bf16 %v142_v37, %v141_v36  ;;  %v100_v49 = vld [vmem:[%s505_s2] sm:$0x3]  ;;  %p368_p3 = por %p367_p2, %p366_p1 }
   0xa   :  { %v119_v51 = vrot.slane %v100_v49, %v118_v48  ;;  %v124_v54 = vrot.slane %v100_v49, %v123_v50  ;;  %v213_v6 = vld [vmem:[%s507_s4] sm:$0x3] }
   0xb   :  { %286 = vmatmul.mubr.msk.f32.vlgmr.msra.gmra.mrb[0].mxu0 %vm26_vm1, %v21_v8  ;;  %334 = vmatpush3.bf16.msra.mxu1 %v333_v20  ;;  %v232_v7 = vrot.slane %v213_v6, %v118_v48  ;;  %p369_p4 = pnand %p368_p3, %p362_p0 }
   0xc   :  { %335 = vmatprep.subr.bf16.mxu1 %v385_v3 }
   0xf   :  { %337 = vmatpush3.bf16.msra.mxu1 %v336_v23 }
  0x10   :  { %338 = vmatprep.subr.bf16.mxu1 %v385_v3 }
  0x13   :  { %340 = vmatpush3.bf16.msra.mxu1 %v339_v26 }
  0x14   :  { %341 = vmatprep.subr.bf16.mxu1 %v385_v3 }
  0x17   :  { %343 = vmatpush3.bf16.msra.mxu1 %v342_v29 }
  0x18   :  { %344 = vmatprep.subr.bf16.mxu1 %v385_v3 }
  0x1b   :  { %346 = vmatpush3.bf16.msra.mxu1 %v345_v32 }
  0x1c   :  { %347 = vmatprep.subr.bf16.mxu1 %v385_v3 }
  0x1f   :  { %349 = vmatpush3.bf16.msra.mxu1 %v348_v35 }
  0x20   :  { %350 = vmatprep.subr.bf16.mxu1 %v385_v3 }
  0x23   :  { %352 = vmatpush3.bf16.msra.mxu1 %v351_v38 }
  0xde   :  { %v96_v9 = vpop.f32.mrb[0].mxu0 }
  0xdf   :  { %101 = vadd.xlane.f32.xlu0 %v96_v9  ;;  %v287_v10 = vpop.f32.mrb[1].mxu0 }
  0xe0   :  { %v237_v10 = vrot.slane %v213_v6, %v123_v50 }
 0x16c   :  { %v102_v14 = vpop.xlane.xlu0 %101 }
 0x16d   :  { %v103_v15 = vmul.f32 0.015625, %v102_v14 }
 0x16f   :  { %v104_v16 = vsub.f32 %v96_v9, %v103_v15  ;;  %v108_v39 = vmul.f32 %v103_v15, %v103_v15 }
 0x171   :  { %v105_v17 = vmul.f32 %v104_v16, %v104_v16  ;;  %v109_v40 = vmul.f32 64.0, %v108_v39 }
 0x173   :  { %106 = vadd.xlane.f32.xlu0 %v105_v17 }
 0x200   :  { %v107_v41 = vpop.xlane.xlu0 %106 }
 0x201   :  { %v110_v42 = vsub.f32 %v107_v41, %v109_v40 }
 0x203   :  { %v111_v43 = vmax.f32 %v110_v42, 0.0 }
 0x205   :  { %v112_v44 = vmul.f32 0.015625, %v111_v43 }
 0x207   :  { %v113_v46 = vadd.f32 1e-05, %v112_v44 }
 0x209   :  { %357 = vrsqrt.f32 %v113_v46 }
 0x213   :  { %v358_v52 = vpop.eup %357 }
 0x214   :  { %v115_v53 = vmul.f32 %v358_v52, %v104_v16 }
 0x216   :  { %v120_v55 = vmul.f32 %v119_v51, %v115_v53 }
 0x218   :  { %v125_v56 = vadd.f32 %v124_v54, %v120_v55 }
 0x21a   :  { %v126_v57 = vmax.f32 %v125_v56, 0.0 }
 0x21c   :  { %321 = vmatmul.mubr.f32.vlgmr.msra.gmra.mrb[0].mxu1 %v126_v57 }
 0x2ef   :  { %v209_v58 = vpop.f32.mrb[0].mxu1 }
 0x2f0   :  { %v322_v59 = vpop.f32.mrb[1].mxu1  ;;  %v215_v60 = vsel %vm214_vm2, %v209_v58, 0.0 }
 0x2f1   :  { %216 = vadd.xlane.f32.xlu1 %v215_v60 }
 0x37e   :  { %v217_v61 = vpop.xlane.xlu1 %216 }
 0x37f   :  { %v218_v62 = vmul.f32 0.0625, %v217_v61 }
 0x381   :  { %v219_v63 = vsub.f32 %v209_v58, %v218_v62 }
 0x383   :  { %v220_v0 = vmul.f32 %v219_v63, %v219_v63 }
 0x385   :  { %v221_v1 = vsel %vm214_vm2, %v220_v0, 0.0 }
 0x386   :  { %222 = vadd.xlane.f32.xlu1 %v221_v1 }
 0x413   :  { %v223_v2 = vpop.xlane.xlu1 %222 }
 0x414   :  { %v224_v3 = vmax.f32 %v223_v2, 0.0 }
 0x416   :  { %v225_v4 = vmul.f32 0.0625, %v224_v3 }
 0x418   :  { %v226_v5 = vadd.f32 1e-05, %v225_v4 }
 0x41a   :  { %359 = vrsqrt.f32 %v226_v5 }
 0x424   :  { %v360_v8 = vpop.eup %359 }
 0x425   :  { %v228_v9 = vmul.f32 %v360_v8, %v219_v63 }
 0x427   :  { %v233_v11 = vmul.f32 %v232_v7, %v228_v9 }
 0x429   :  { %v238_v12 = vadd.f32 %v237_v10, %v233_v11 }
 0x42b   :  { %239 = vst.msk [vmem:[#allocation2] sm:$0xff] %vm214_vm2, %v238_v12 }
 0x42c   :  { %372 = shalt.err (!%p369_p4)
}
 0x42d   :  { %s373_s12 = scalar_lea.hbm %s508_s5, 128 }
 0x42e   :  { %p374_p5 = scmp.ne.s32.totalorder %s508_s5, %s373_s12  ;;  %p377_p6 = scmp.lt.u32.totalorder %s373_s12, %s508_s5 }
 0x430   :  { %p379_p7 = pnand %p377_p6, %p374_p5 }
 0x432   :  { %382 = shalt.err (!%p379_p7)
}
 0x433   :  { %249 = dma.vmem_to_hbm [thread:$0]  %s247_s9, 128, %s508_s5, [#allocation3]  }
 0x434   :  { %383 = dma.done.wait [#allocation3], 128  }
 0x435   :  { %384 = vsyncadd [#allocation3], 4294967168 }
 0x436   :  { %253 = vsyncpa [#allocation3], 1 }

</bundles_post_ra>
